<compile_context>
chip_gen: v7x
topology: tpu7x:2x2x1
jax: 0.10.0
libtpu: 0.0.40
codegen_flags: <defaults>
</compile_context>

<pallas_src>
from functools import partial

import numpy as np
import jax
import jax.numpy as jnp
from jax import lax
from jax.experimental import pallas as pl
from jax.experimental.pallas import tpu as pltpu


def _du_kernel(x_ref, nmu_ref, nstd_ref, o_ref, *, eps, factor):
    """One channel-tile of DistributionUncertainty.

    x_ref    : (B, TC, HW) input tile
    nmu_ref  : (B, TC, 1)  gaussian noise for beta
    nstd_ref : (B, TC, 1)  gaussian noise for gamma
    o_ref    : (B, TC, HW) output tile
    """
    x = x_ref[...].astype(jnp.float32)
    B, TC, HW = x.shape

    # Per-(b, c) spatial mean and unbiased variance (two-pass for stability).
    mean = jnp.mean(x, axis=2, keepdims=True)                       # (B, TC, 1)
    diff = x - mean
    var = jnp.sum(diff * diff, axis=2, keepdims=True) / (HW - 1)    # (B, TC, 1)
    std = jnp.sqrt(var + eps)
    inv_std = lax.rsqrt(var + eps)

    # Cross-batch sqrt-variance (unbiased) of mean and std, per channel.
    mean_b = jnp.mean(mean, axis=0, keepdims=True)                  # (1, TC, 1)
    sqrtvar_mu = jnp.sqrt(
        jnp.sum((mean - mean_b) ** 2, axis=0, keepdims=True) / (B - 1) + eps)
    std_b = jnp.mean(std, axis=0, keepdims=True)
    sqrtvar_std = jnp.sqrt(
        jnp.sum((std - std_b) ** 2, axis=0, keepdims=True) / (B - 1) + eps)

    # Reparameterize with caller-supplied gaussian noise.
    beta = mean + nmu_ref[...].astype(jnp.float32) * factor * sqrtvar_mu
    gamma = std + nstd_ref[...].astype(jnp.float32) * factor * sqrtvar_std

    # Fold normalize + affine into a single fused multiply-add per element.
    scale = gamma * inv_std                                          # (B, TC, 1)
    shift = beta - mean * scale                                      # (B, TC, 1)
    o_ref[...] = (x * scale + shift).astype(o_ref.dtype)


def _pick_channel_tile(B, C, HW, budget_bytes=3 * 1024 * 1024):
    """Largest channel tile (multiple of 8 dividing C, or full C) in budget."""
    hw_vmem = ((HW + 127) // 128) * 128        # lane-padded VMEM footprint
    per_channel = B * hw_vmem * 4              # f32 working set per channel
    max_tc = budget_bytes // per_channel
    if C <= max_tc:
        return C
    if max_tc < 8:
        # TODO(synk): for huge B*HW add an HW grid axis with per-(B,C)
        # accumulators; for now take the smallest sublane-aligned tile.
        return 8 if C % 8 == 0 else C
    tc = (min(max_tc, C) // 8) * 8
    while tc >= 8:
        if C % tc == 0:
            return tc
        tc -= 8
    return C


def _du_pallas_impl(x, noise_mu, noise_std, *, eps=1e-8, factor=1.0):
    """Apply DistributionUncertainty to NCHW x with the given gaussian noise."""
    B, C, H, W = x.shape
    HW = H * W

    x3 = x.reshape(B, C, HW)                   # layout-preserving, no HBM copy
    nmu = noise_mu.reshape(B, C, 1)
    nstd = noise_std.reshape(B, C, 1)

    tc = _pick_channel_tile(B, C, HW)
    grid = (C // tc,)

    out3 = pl.pallas_call(
        partial(_du_kernel, eps=eps, factor=factor),
        out_shape=jax.ShapeDtypeStruct((B, C, HW), x.dtype),
        grid=grid,
        in_specs=[
            pl.BlockSpec((B, tc, HW), lambda c: (0, c, 0)),
            pl.BlockSpec((B, tc, 1), lambda c: (0, c, 0)),
            pl.BlockSpec((B, tc, 1), lambda c: (0, c, 0)),
        ],
        out_specs=pl.BlockSpec((B, tc, HW), lambda c: (0, c, 0)),
        compiler_params=pltpu.CompilerParams(
            dimension_semantics=("parallel",),
            vmem_limit_bytes=32 * 1024 * 1024,
        ),
    )(x3, nmu, nstd)

    return out3.reshape(B, C, H, W)


_du_pallas = jax.jit(_du_pallas_impl, static_argnames=("eps", "factor"))


def distribution_uncertainty(x, key, *, p=0.5, eps=1e-8, factor=1.0,
                             training=True, gate_rng=None):
    """Full module semantics: host-side stochastic gate + feature-stat noise.

    The gate uses host numpy RNG (matching PyTorch's `np.random.random()`),
    avoiding a blocking device->host sync / ConcretizationTypeError under jit.
    """
    if not training:
        return x
    u = gate_rng.random() if gate_rng is not None else np.random.random()
    if u > p:
        return x
    kmu, kstd = jax.random.split(key)
    B, C, _, _ = x.shape
    noise_mu = jax.random.normal(kmu, (B, C), jnp.float32).astype(x.dtype)
    noise_std = jax.random.normal(kstd, (B, C), jnp.float32).astype(x.dtype)
    return _du_pallas(x, noise_mu, noise_std, eps=eps, factor=factor)


def _reference(x, noise_mu, noise_std, eps=1e-8, factor=1.0):
    """Pure-JAX reference mirroring the PyTorch forward."""
    mean = x.mean(axis=(2, 3))
    std = jnp.sqrt(x.var(axis=(2, 3), ddof=1) + eps)
    sv_mu = jnp.sqrt(mean.var(axis=0, ddof=1, keepdims=True) + eps)
    sv_std = jnp.sqrt(std.var(axis=0, ddof=1, keepdims=True) + eps)
    beta = mean + noise_mu * factor * sv_mu
    gamma = std + noise_std * factor * sv_std
    xn = (x - mean[:, :, None, None]) / std[:, :, None, None]
    return xn * gamma[:, :, None, None] + beta[:, :, None, None]


if __name__ == "__main__":
    key = jax.random.PRNGKey(0)
    kx, kmu, kstd, kx2, kmu2, kstd2, kcall = jax.random.split(key, 7)

    # Case 1: HW already a lane multiple (16*16 = 256).
    B, C, H, W = 2, 4, 16, 16
    x = jax.random.normal(kx, (B, C, H, W), jnp.float32)
    noise_mu = jax.random.normal(kmu, (B, C), jnp.float32)
    noise_std = jax.random.normal(kstd, (B, C), jnp.float32)
    y = _du_pallas(x, noise_mu, noise_std)
    jax.block_until_ready(y)
    y_ref = _reference(x, noise_mu, noise_std)
    assert jnp.allclose(y, y_ref, atol=1e-4, rtol=1e-4), "mismatch vs reference (dense HW)"

    # Case 2: HW not a multiple of 128 (10*10 = 100) — exercises the ragged
    # lane dimension without any wrapper-side padding.
    B2, C2, H2, W2 = 2, 8, 10, 10
    x2 = jax.random.normal(kx2, (B2, C2, H2, W2), jnp.float32)
    nmu2 = jax.random.normal(kmu2, (B2, C2), jnp.float32)
    nstd2 = jax.random.normal(kstd2, (B2, C2), jnp.float32)
    y2 = _du_pallas(x2, nmu2, nstd2)
    jax.block_until_ready(y2)
    y2_ref = _reference(x2, nmu2, nstd2)
    assert jnp.allclose(y2, y2_ref, atol=1e-4, rtol=1e-4), "mismatch vs reference (ragged HW)"

    # Exercise the full module wrapper (p=1.0 guarantees the branch runs).
    y3 = distribution_uncertainty(x, kcall, p=1.0, training=True,
                                  gate_rng=np.random.default_rng(0))
    jax.block_until_ready(y3)

    print("KERNEL_OK")
</pallas_src>

<mosaic_0001>
module attributes {stable_mosaic.version = 11 : i64} {
  func.func @_du_kernel(%arg0: i32, %arg1: memref<2x4x256xf32, #tpu.memory_space<vmem>>, %arg2: memref<2x4x1xf32, #tpu.memory_space<vmem>>, %arg3: memref<2x4x1xf32, #tpu.memory_space<vmem>>, %arg4: memref<2x4x256xf32, #tpu.memory_space<vmem>>) attributes {dimension_semantics = [#tpu.dimension_semantics<parallel>], iteration_bounds = array<i64: 1>, scalar_prefetch = 0 : i64, scratch_operands = 0 : i64, tpu.core_type = #tpu.core_type<tc>, window_params = [{transform_indices = @transform_0, window_bounds = array<i64: 2, 4, 256>}, {transform_indices = @transform_1, window_bounds = array<i64: 2, 4, 1>}, {transform_indices = @transform_2, window_bounds = array<i64: 2, 4, 1>}, {transform_indices = @transform_3, window_bounds = array<i64: 2, 4, 256>}]} {
    %c0 = arith.constant 0 : index
    %c0_0 = arith.constant 0 : index
    %c0_1 = arith.constant 0 : index
    %0 = vector.load %arg1[%c0, %c0_0, %c0_1] : memref<2x4x256xf32, #tpu.memory_space<vmem>>, vector<2x4x256xf32>
    %cst = arith.constant dense<0.000000e+00> : vector<2x4xf32>
    %1 = vector.multi_reduction <add>, %0, %cst [2] : vector<2x4x256xf32> to vector<2x4xf32>
    %2 = vector.shape_cast %1 : vector<2x4xf32> to vector<2x4x1xf32>
    %cst_2 = arith.constant 2.560000e+02 : f32
    %3 = vector.broadcast %cst_2 : f32 to vector<2x4x1xf32>
    %4 = arith.divf %2, %3 : vector<2x4x1xf32>
    %5 = vector.broadcast %4 : vector<2x4x1xf32> to vector<2x4x256xf32>
    %6 = arith.subf %0, %5 : vector<2x4x256xf32>
    %7 = arith.mulf %6, %6 : vector<2x4x256xf32>
    %cst_3 = arith.constant dense<0.000000e+00> : vector<2x4xf32>
    %8 = vector.multi_reduction <add>, %7, %cst_3 [2] : vector<2x4x256xf32> to vector<2x4xf32>
    %9 = vector.shape_cast %8 : vector<2x4xf32> to vector<2x4x1xf32>
    %cst_4 = arith.constant 2.550000e+02 : f32
    %10 = vector.broadcast %cst_4 : f32 to vector<2x4x1xf32>
    %11 = arith.divf %9, %10 : vector<2x4x1xf32>
    %cst_5 = arith.constant 9.99999993E-9 : f32
    %12 = vector.broadcast %cst_5 : f32 to vector<2x4x1xf32>
    %13 = arith.addf %11, %12 : vector<2x4x1xf32>
    %14 = math.sqrt %13 : vector<2x4x1xf32>
    %cst_6 = arith.constant 9.99999993E-9 : f32
    %15 = vector.broadcast %cst_6 : f32 to vector<2x4x1xf32>
    %16 = arith.addf %11, %15 : vector<2x4x1xf32>
    %17 = math.rsqrt %16 : vector<2x4x1xf32>
    %cst_7 = arith.constant dense<0.000000e+00> : vector<4x1xf32>
    %18 = vector.multi_reduction <add>, %4, %cst_7 [0] : vector<2x4x1xf32> to vector<4x1xf32>
    %19 = vector.shape_cast %18 : vector<4x1xf32> to vector<1x4x1xf32>
    %cst_8 = arith.constant 2.000000e+00 : f32
    %20 = vector.broadcast %cst_8 : f32 to vector<1x4x1xf32>
    %21 = arith.divf %19, %20 : vector<1x4x1xf32>
    %22 = vector.broadcast %21 : vector<1x4x1xf32> to vector<2x4x1xf32>
    %23 = arith.subf %4, %22 : vector<2x4x1xf32>
    %24 = arith.mulf %23, %23 : vector<2x4x1xf32>
    %cst_9 = arith.constant dense<0.000000e+00> : vector<4x1xf32>
    %25 = vector.multi_reduction <add>, %24, %cst_9 [0] : vector<2x4x1xf32> to vector<4x1xf32>
    %26 = vector.shape_cast %25 : vector<4x1xf32> to vector<1x4x1xf32>
    %cst_10 = arith.constant 1.000000e+00 : f32
    %27 = vector.broadcast %cst_10 : f32 to vector<1x4x1xf32>
    %28 = arith.divf %26, %27 : vector<1x4x1xf32>
    %cst_11 = arith.constant 9.99999993E-9 : f32
    %29 = vector.broadcast %cst_11 : f32 to vector<1x4x1xf32>
    %30 = arith.addf %28, %29 : vector<1x4x1xf32>
    %31 = math.sqrt %30 : vector<1x4x1xf32>
    %cst_12 = arith.constant dense<0.000000e+00> : vector<4x1xf32>
    %32 = vector.multi_reduction <add>, %14, %cst_12 [0] : vector<2x4x1xf32> to vector<4x1xf32>
    %33 = vector.shape_cast %32 : vector<4x1xf32> to vector<1x4x1xf32>
    %cst_13 = arith.constant 2.000000e+00 : f32
    %34 = vector.broadcast %cst_13 : f32 to vector<1x4x1xf32>
    %35 = arith.divf %33, %34 : vector<1x4x1xf32>
    %36 = vector.broadcast %35 : vector<1x4x1xf32> to vector<2x4x1xf32>
    %37 = arith.subf %14, %36 : vector<2x4x1xf32>
    %38 = arith.mulf %37, %37 : vector<2x4x1xf32>
    %cst_14 = arith.constant dense<0.000000e+00> : vector<4x1xf32>
    %39 = vector.multi_reduction <add>, %38, %cst_14 [0] : vector<2x4x1xf32> to vector<4x1xf32>
    %40 = vector.shape_cast %39 : vector<4x1xf32> to vector<1x4x1xf32>
    %cst_15 = arith.constant 1.000000e+00 : f32
    %41 = vector.broadcast %cst_15 : f32 to vector<1x4x1xf32>
    %42 = arith.divf %40, %41 : vector<1x4x1xf32>
    %cst_16 = arith.constant 9.99999993E-9 : f32
    %43 = vector.broadcast %cst_16 : f32 to vector<1x4x1xf32>
    %44 = arith.addf %42, %43 : vector<1x4x1xf32>
    %45 = math.sqrt %44 : vector<1x4x1xf32>
    %c0_17 = arith.constant 0 : index
    %c0_18 = arith.constant 0 : index
    %c0_19 = arith.constant 0 : index
    %46 = vector.load %arg2[%c0_17, %c0_18, %c0_19] : memref<2x4x1xf32, #tpu.memory_space<vmem>>, vector<2x4x1xf32>
    %cst_20 = arith.constant 1.000000e+00 : f32
    %47 = vector.broadcast %cst_20 : f32 to vector<2x4x1xf32>
    %48 = arith.mulf %46, %47 : vector<2x4x1xf32>
    %49 = vector.broadcast %31 : vector<1x4x1xf32> to vector<2x4x1xf32>
    %50 = arith.mulf %48, %49 : vector<2x4x1xf32>
    %51 = arith.addf %4, %50 : vector<2x4x1xf32>
    %c0_21 = arith.constant 0 : index
    %c0_22 = arith.constant 0 : index
    %c0_23 = arith.constant 0 : index
    %52 = vector.load %arg3[%c0_21, %c0_22, %c0_23] : memref<2x4x1xf32, #tpu.memory_space<vmem>>, vector<2x4x1xf32>
    %cst_24 = arith.constant 1.000000e+00 : f32
    %53 = vector.broadcast %cst_24 : f32 to vector<2x4x1xf32>
    %54 = arith.mulf %52, %53 : vector<2x4x1xf32>
    %55 = vector.broadcast %45 : vector<1x4x1xf32> to vector<2x4x1xf32>
    %56 = arith.mulf %54, %55 : vector<2x4x1xf32>
    %57 = arith.addf %14, %56 : vector<2x4x1xf32>
    %58 = arith.mulf %57, %17 : vector<2x4x1xf32>
    %59 = arith.mulf %4, %58 : vector<2x4x1xf32>
    %60 = arith.subf %51, %59 : vector<2x4x1xf32>
    %61 = vector.broadcast %58 : vector<2x4x1xf32> to vector<2x4x256xf32>
    %62 = arith.mulf %0, %61 : vector<2x4x256xf32>
    %63 = vector.broadcast %60 : vector<2x4x1xf32> to vector<2x4x256xf32>
    %64 = arith.addf %62, %63 : vector<2x4x256xf32>
    %c0_25 = arith.constant 0 : index
    %c0_26 = arith.constant 0 : index
    %c0_27 = arith.constant 0 : index
    %65 = vector.load %arg4[%c0_25, %c0_26, %c0_27] : memref<2x4x256xf32, #tpu.memory_space<vmem>>, vector<2x4x256xf32>
    tpu.vector_store %arg4[%c0_25, %c0_26, %c0_27], %64 {strides = array<i32>} : memref<2x4x256xf32, #tpu.memory_space<vmem>>, vector<2x4x256xf32>,
    return
  }
  func.func @transform_0(%arg0: i32) -> (i32, i32, i32) {
    %c0_i32 = arith.constant 0 : i32
    %c0_i32_0 = arith.constant 0 : i32
    %c0_i32_1 = arith.constant 0 : i32
    return %c0_i32, %arg0, %c0_i32_0 : i32, i32, i32
  }
  func.func @transform_1(%arg0: i32) -> (i32, i32, i32) {
    %c0_i32 = arith.constant 0 : i32
    %c0_i32_0 = arith.constant 0 : i32
    %c0_i32_1 = arith.constant 0 : i32
    return %c0_i32, %arg0, %c0_i32_0 : i32, i32, i32
  }
  func.func @transform_2(%arg0: i32) -> (i32, i32, i32) {
    %c0_i32 = arith.constant 0 : i32
    %c0_i32_0 = arith.constant 0 : i32
    %c0_i32_1 = arith.constant 0 : i32
    return %c0_i32, %arg0, %c0_i32_0 : i32, i32, i32
  }
  func.func @transform_3(%arg0: i32) -> (i32, i32, i32) {
    %c0_i32 = arith.constant 0 : i32
    %c0_i32_0 = arith.constant 0 : i32
    %c0_i32_1 = arith.constant 0 : i32
    return %c0_i32, %arg0, %c0_i32_0 : i32, i32, i32
  }
}

</mosaic_0001>

<bundles_post_ra>
// kernel: _du_pallas_impl.1
= control target key start
LH: loop header
LB: loop body
LE: loop exit
PB: predicated region body
PF: predicated region fallthrough
CT: control target
= control target key end

     0   :  { %vm22_vm0 = vcmask 1043456   ;;  %v224_v10 = vmov 839922192   ;;  %v41_v12 = vlaneseq  ;;  %v225_v34 = vmov 0   ;;  %s322_s0 = inlined_call_operand.vmem [shape: f32[2,4,256], index: 0, kind: input, shape index: {}]   ;;  %s323_s2 = inlined_call_operand.vmem [shape: f32[2,4,1], index: 2, kind: input, shape index: {}]   ;;  %s324_s1 = inlined_call_operand.vmem [shape: f32[2,4,1], index: 1, kind: input, shape index: {}]   ;;  %s325_s3 = inlined_call_operand.vmem [shape: f32[2,4,256], index: 3, kind: output, shape index: {}]  }
   0x1   :  { %v249_v0 = vld [vmem:[%s322_s0] sm:$0xff]  ;;  %v254_v1 = vld [vmem:[%s322_s0 + $0x8] sm:$0xff]  ;;  %v39_v11 = vunpack.c.l.s4 %v224_v10  ;;  %213 = vset.pattern.permute.xlu1 %v225_v34  ;;  %212 = vset.pattern.permute.xlu0 %v225_v34 }
   0x2   :  { %v18_v2 = vcombine.high %v249_v0, %v249_v0  ;;  %v23_v3 = vsel %vm22_vm0, %v249_v0, 0.0  ;;  %v19_v4 = vcombine.high %v254_v1, %v254_v1  ;;  %v28_v6 = vsel %vm22_vm0, %v254_v1, 0.0  ;;  %v135_v34 = vld [vmem:[%s324_s1 + $0x4] sm:$0xf] }
   0x3   :  { %v40_v13 = vunpack.c.0.s8 %v39_v11  ;;  %v42_v14 = vshrl.u32 %v41_v12, 7 }
   0x4   :  { %v24_v5 = vsel %vm22_vm0, %v18_v2, 0.0  ;;  %v29_v7 = vsel %vm22_vm0, %v19_v4, 0.0 }
   0x5   :  { %v25_v8 = vadd.f32 %v24_v5, %v23_v3  ;;  %v30_v9 = vadd.f32 %v29_v7, %v28_v6  ;;  %v266_v15 = vsub.s32 %v40_v13, %v42_v14 }
   0x7   :  { %26 = vadd.xlane.f32.xlu0 %v25_v8 }
   0xb   :  { %31 = vadd.xlane.f32.xlu0 %v30_v9 }
  0x94   :  { %v27_v16 = vpop.xlane.xlu0 %26 }
  0x95   :  { %v268_v17 = vmul.f32 0.00390625, %v27_v16 }
  0x97   :  { %v44_v18 = vrot.slane %v268_v17, %v266_v15  ;;  %v95_v38 = vsel %vm22_vm0, %v268_v17, 0.0 }
  0x98   :  { %v32_v19 = vpop.xlane.xlu0 %31 }
  0x99   :  { %v272_v20 = vmul.f32 0.00390625, %v32_v19  ;;  %v54_v21 = vsub.f32 %v249_v0, %v44_v18 }
  0x9b   :  { %v56_v22 = vmul.f32 %v54_v21, %v54_v21  ;;  %v51_v23 = vrot.slane %v272_v20, %v266_v15  ;;  %v96_v36 = vsel %vm22_vm0, %v272_v20, 0.0 }
  0x9c   :  { %v97_v40 = vadd.f32 %v96_v36, %v95_v38 }
  0x9d   :  { %v60_v24 = vcombine.high %v56_v22, %v56_v22  ;;  %v55_v25 = vsub.f32 %v254_v1, %v51_v23  ;;  %v64_v26 = vsel %vm22_vm0, %v56_v22, 0.0  ;;  %v141_v23 = vld [vmem:[%s323_s2 + $0x4] sm:$0xf] }
  0x9e   :  { %v99_v44 = vmul.f32 0.5, %v97_v40 }
  0x9f   :  { %v65_v27 = vsel %vm22_vm0, %v60_v24, 0.0  ;;  %v57_v28 = vmul.f32 %v55_v25, %v55_v25  ;;  %v140_v24 = vld [vmem:[%s323_s2] sm:$0xf] }
  0xa0   :  { %v66_v29 = vadd.f32 %v65_v27, %v64_v26  ;;  %v100_v45 = vsub.f32 %v268_v17, %v99_v44  ;;  %v101_v46 = vsub.f32 %v272_v20, %v99_v44 }
  0xa1   :  { %v61_v30 = vcombine.high %v57_v28, %v57_v28  ;;  %v69_v31 = vsel %vm22_vm0, %v57_v28, 0.0  ;;  %v134_v28 = vld [vmem:[%s324_s1] sm:$0xf] }
  0xa2   :  { %67 = vadd.xlane.f32.xlu1 %v66_v29  ;;  %v102_v48 = vmul.f32 %v100_v45, %v100_v45  ;;  %v103_v50 = vmul.f32 %v101_v46, %v101_v46 }
  0xa3   :  { %v70_v32 = vsel %vm22_vm0, %v61_v30, 0.0 }
  0xa4   :  { %v71_v33 = vadd.f32 %v70_v32, %v69_v31  ;;  %v104_v54 = vsel %vm22_vm0, %v102_v48, 0.0  ;;  %v105_v56 = vsel %vm22_vm0, %v103_v50, 0.0 }
  0xa5   :  { %v106_v61 = vadd.f32 %v105_v56, %v104_v54 }
  0xa6   :  { %72 = vadd.xlane.f32.xlu1 %v71_v33 }
  0xa7   :  { %v107_v4 = vadd.f32 1e-08, %v106_v61 }
  0xa9   :  { %vm110_vm5 = vcmp.eq.f32.partialorder %v107_v4, inf  ;;  %v113_v21 = vand.u32 2147483648, %v107_v4  ;;  %vm112_vm8 = vcmp.eq.f32.partialorder %v107_v4, 0.0 }
 0x12f   :  { %v68_v35 = vpop.xlane.xlu1 %67 }
 0x130   :  { %v75_v37 = vmul.f32 0.003921569, %v68_v35 }
 0x132   :  { %v77_v39 = vadd.f32 1e-08, %v75_v37 }
 0x133   :  { %v73_v41 = vpop.xlane.xlu1 %72 }
 0x134   :  { %216 = vrsqrt.f32 %v77_v39  ;;  %v76_v42 = vmul.f32 0.003921569, %v73_v41  ;;  %vm81_vm1 = vcmp.eq.f32.partialorder %v77_v39, inf  ;;  %v84_v53 = vand.u32 2147483648, %v77_v39 }
 0x135   :  { %vm83_vm2 = vcmp.eq.f32.partialorder %v77_v39, 0.0 }
 0x136   :  { %v78_v43 = vadd.f32 1e-08, %v76_v42 }
 0x138   :  { %218 = vrsqrt.f32 %v78_v43  ;;  %vm88_vm3 = vcmp.eq.f32.partialorder %v78_v43, inf  ;;  %v91_v58 = vand.u32 2147483648, %v78_v43  ;;  %vm90_vm4 = vcmp.eq.f32.partialorder %v78_v43, 0.0 }
 0x139   :  { %220 = vrsqrt.f32 %v107_v4 }
 0x13e   :  { %v217_v47 = vpop.eup %216 }
 0x13f   :  { %v80_v49 = vmul.f32 %v217_v47, %v77_v39 }
 0x141   :  { %v82_v51 = vsel %vm81_vm1, %v77_v39, %v80_v49 }
 0x142   :  { %v219_v52 = vpop.eup %218  ;;  %v85_v57 = vsel %vm83_vm2, %v84_v53, %v82_v51 }
 0x143   :  { %v87_v55 = vmul.f32 %v219_v52, %v78_v43  ;;  %v115_v62 = vsel %vm22_vm0, %v85_v57, 0.0  ;;  %v221_v13 = vpop.eup %220 }
 0x144   :  { %v109_v14 = vmul.f32 %v221_v13, %v107_v4 }
 0x145   :  { %v89_v59 = vsel %vm88_vm3, %v78_v43, %v87_v55 }
 0x146   :  { %v92_v60 = vsel %vm90_vm4, %v91_v58, %v89_v59  ;;  %v111_v19 = vsel %vm110_vm5, %v107_v4, %v109_v14 }
 0x147   :  { %v116_v63 = vsel %vm22_vm0, %v92_v60, 0.0  ;;  %v114_v27 = vsel %vm112_vm8, %v113_v21, %v111_v19 }
 0x148   :  { %v117_v2 = vadd.f32 %v116_v63, %v115_v62  ;;  %v136_v33 = vmul.f32 %v134_v28, %v114_v27  ;;  %v137_v39 = vmul.f32 %v135_v34, %v114_v27 }
 0x14a   :  { %v118_v3 = vmul.f32 0.5, %v117_v2  ;;  %v138_v37 = vadd.f32 %v136_v33, %v268_v17  ;;  %v139_v42 = vadd.f32 %v137_v39, %v272_v20 }
 0x14c   :  { %v119_v5 = vsub.f32 %v85_v57, %v118_v3  ;;  %v120_v6 = vsub.f32 %v92_v60, %v118_v3 }
 0x14e   :  { %v121_v7 = vmul.f32 %v119_v5, %v119_v5  ;;  %v122_v8 = vmul.f32 %v120_v6, %v120_v6 }
 0x150   :  { %v123_v9 = vsel %vm22_vm0, %v121_v7, 0.0  ;;  %v124_v10 = vsel %vm22_vm0, %v122_v8, 0.0 }
 0x151   :  { %v125_v11 = vadd.f32 %v124_v10, %v123_v9 }
 0x153   :  { %v126_v12 = vadd.f32 1e-08, %v125_v11 }
 0x155   :  { %222 = vrsqrt.f32 %v126_v12  ;;  %vm129_vm6 = vcmp.eq.f32.partialorder %v126_v12, inf  ;;  %v132_v22 = vand.u32 2147483648, %v126_v12  ;;  %vm131_vm7 = vcmp.eq.f32.partialorder %v126_v12, 0.0 }
 0x15f   :  { %v223_v16 = vpop.eup %222 }
 0x160   :  { %v128_v18 = vmul.f32 %v223_v16, %v126_v12 }
 0x162   :  { %v130_v25 = vsel %vm129_vm6, %v126_v12, %v128_v18 }
 0x163   :  { %v133_v26 = vsel %vm131_vm7, %v132_v22, %v130_v25 }
 0x164   :  { %v143_v29 = vmul.f32 %v141_v23, %v133_v26  ;;  %v142_v30 = vmul.f32 %v140_v24, %v133_v26 }
 0x166   :  { %v145_v31 = vadd.f32 %v143_v29, %v92_v60  ;;  %v144_v32 = vadd.f32 %v142_v30, %v85_v57 }
 0x168   :  { %v147_v35 = vmul.f32 %v219_v52, %v145_v31  ;;  %v146_v36 = vmul.f32 %v217_v47, %v144_v32 }
 0x16a   :  { %158 = vperm.xlu1 %213, %v147_v35   ;;  %154 = vperm.xlu0 %212, %v146_v36   ;;  %v148_v38 = vmul.f32 %v146_v36, %v268_v17  ;;  %v149_v41 = vmul.f32 %v147_v35, %v272_v20 }
 0x16c   :  { %v150_v40 = vsub.f32 %v138_v37, %v148_v38  ;;  %v151_v43 = vsub.f32 %v139_v42, %v149_v41 }
 0x16e   :  { %180 = vperm.xlu1 %213, %v150_v40  }
 0x172   :  { %184 = vperm.xlu1 %213, %v151_v43  }
 0x1e9   :  { %v159_v44 = vpop.permute.xlu1 %158  ;;  %v155_v45 = vpop.permute.xlu0 %154 }
 0x1ea   :  { %v166_v46 = vrot.slane %v155_v45, %v266_v15  ;;  %v173_v48 = vrot.slane %v159_v44, %v266_v15 }
 0x1ec   :  { %v176_v49 = vmul.f32 %v166_v46, %v249_v0  ;;  %v177_v52 = vmul.f32 %v173_v48, %v254_v1 }
 0x1ed   :  { %v181_v47 = vpop.permute.xlu1 %180 }
 0x1ee   :  { %v192_v17 = vrot.slane %v181_v47, %v266_v15 }
 0x1f0   :  { %v202_v50 = vadd.f32 %v192_v17, %v176_v49 }
 0x1f1   :  { %v185_v51 = vpop.permute.xlu1 %184 }
 0x1f2   :  { %204 = vst [vmem:[%s325_s3] sm:$0xff] %v202_v50  ;;  %v199_v20 = vrot.slane %v185_v51, %v266_v15 }
 0x1f4   :  { %v203_v53 = vadd.f32 %v199_v20, %v177_v52 }
 0x1f6   :  { %205 = vst [vmem:[%s325_s3 + $0x8] sm:$0xff] %v203_v53 }

</bundles_post_ra>
